<compile_context>
chip_gen: v7x
topology: tpu7x:2x2x1
jax: 0.10.0
libtpu: 0.0.40
codegen_flags: <defaults>
</compile_context>

<pallas_src>
import functools

import jax
import jax.numpy as jnp
import numpy as np
from jax.experimental import pallas as pl
from jax.experimental.pallas import tpu as pltpu


def _round_up(x: int, m: int) -> int:
    return ((x + m - 1) // m) * m


def _cdiv(a: int, b: int) -> int:
    return -(-a // b)


def _verification_kernel(x_ref, w1_ref, b1_ref, wf_ref, bf_ref, o_ref,
                         *, tile_rows, valid_rows):
    """One batch tile per grid step; weights stay VMEM-resident across steps."""
    i = pl.program_id(0)
    # Cast the streamed tile to the matmul dtype (bf16 path) on the VPU; no-op in f32.
    x = x_ref[...].astype(w1_ref.dtype)                                    # (TB, F)
    h = jnp.dot(x, w1_ref[...], preferred_element_type=jnp.float32)        # (TB, Hp) MXU
    h = jnp.maximum(h + b1_ref[...], 0.0)                                  # ReLU(fc1), f32
    props = jnp.dot(h.astype(wf_ref.dtype), wf_ref[...],
                    preferred_element_type=jnp.float32)                    # (TB, Cp) MXU
    props = props + bf_ref[...]                                            # folded fc2 + property layer
    if valid_rows is not None:
        # Grid over-covers the batch; rows past the true batch size hold undefined
        # data -> mask them (on props, not x) to +inf so the min is exact.
        row = i * tile_rows + jax.lax.broadcasted_iota(jnp.int32, props.shape, 0)
        props = jnp.where(row < valid_rows, props, jnp.inf)
    o_ref[0, 0] = jnp.min(props)                                           # per-tile partial min -> SMEM


def verification_network_forward(x, w1, b1, w2, b2, wp, *,
                                 batch_tile=512, use_bf16=True):
    """x:(B,F) w1:(F,H) b1:(1,H) w2:(H,C) b2:(1,C) wp:(C,C-1) -> scalar global min.

    Weights are stored transposed vs. PyTorch, i.e. (in, out), so the kernel
    computes x @ W directly on the MXU.  `use_bf16=True` runs both matmuls with
    bf16 operands (f32 accumulation) for screening; set False for exact f32.
    """
    B, F = x.shape
    H = w1.shape[1]
    Cm1 = wp.shape[1]
    mm_dtype = jnp.bfloat16 if use_bf16 else jnp.float32

    # ---- host-side weight prep (exact in f32) ------------------------------
    # Fold fc2 with the bias-free +/-1 property layer: each W' entry is a single
    # f32 subtraction of two w2 columns, so the fold itself is exactly rounded.
    w_fused = w2.astype(jnp.float32) @ wp.astype(jnp.float32)          # (H, C-1)
    b_fused = b2.astype(jnp.float32) @ wp.astype(jnp.float32)          # (1, C-1)

    # Lane-align H (fc1 out / fc2 in) and C-1 (property count).
    Hp = max(_round_up(H, 128), 128)
    Cp = max(_round_up(Cm1, 128), 128)

    # Zero-pad H: relu(x@0 + 0) = 0 and the padded W' rows are zero -> exact.
    w1p = jnp.zeros((F, Hp), jnp.float32).at[:, :H].set(w1.astype(jnp.float32))
    b1p = jnp.zeros((1, Hp), jnp.float32).at[:, :H].set(b1.astype(jnp.float32))
    # Pad property columns with duplicates of column 0 -> min unchanged, lane-dense.
    if Cp > Cm1:
        w_fused = jnp.concatenate(
            [w_fused, jnp.broadcast_to(w_fused[:, :1], (H, Cp - Cm1))], axis=1)
        b_fused = jnp.concatenate(
            [b_fused, jnp.broadcast_to(b_fused[:, :1], (1, Cp - Cm1))], axis=1)
    wfp = jnp.zeros((Hp, Cp), jnp.float32).at[:H, :].set(w_fused)
    bfp = b_fused.astype(jnp.float32)

    w1k = w1p.astype(mm_dtype)
    wfk = wfp.astype(mm_dtype)

    # ---- batch tiling -------------------------------------------------------
    if B <= batch_tile:
        if B >= 16:
            # v7x megacore: split into (at least) two tiles so both TCs get work.
            tb = _round_up(_cdiv(B, 2), 8)
        else:
            tb = B                      # block == full array dim: no 8-row constraint
    else:
        tb = batch_tile
    num_tiles = _cdiv(B, tb)
    needs_mask = num_tiles * tb != B    # static: grid over-covers the batch

    kernel = functools.partial(_verification_kernel,
                               tile_rows=tb,
                               valid_rows=B if needs_mask else None)

    flops = int(2 * B * (F * Hp + Hp * Cp))
    bytes_accessed = int(B * F * x.dtype.itemsize
                         + w1k.size * w1k.dtype.itemsize
                         + wfk.size * wfk.dtype.itemsize
                         + (Hp + Cp) * 4
                         + num_tiles * 4)

    partial_mins = pl.pallas_call(
        kernel,
        out_shape=jax.ShapeDtypeStruct((num_tiles, 1), jnp.float32),
        grid=(num_tiles,),
        in_specs=[
            pl.BlockSpec((tb, F), lambda i: (i, 0)),       # x streams per batch tile
            pl.BlockSpec((F, Hp), lambda i: (0, 0)),       # w1   resident (constant index map)
            pl.BlockSpec((1, Hp), lambda i: (0, 0)),       # b1   resident
            pl.BlockSpec((Hp, Cp), lambda i: (0, 0)),      # W' = w2@wp resident
            pl.BlockSpec((1, Cp), lambda i: (0, 0)),       # b' = b2@wp resident
        ],
        out_specs=pl.BlockSpec((1, 1), lambda i: (i, 0),
                               memory_space=pltpu.MemorySpace.SMEM),
        compiler_params=pltpu.CompilerParams(
            dimension_semantics=("parallel",),             # v7x: shard batch tiles across both TCs
            vmem_limit_bytes=32 * 1024 * 1024,             # raise v5e's 16 MiB scoped default
        ),
        cost_estimate=pl.CostEstimate(flops=flops,
                                      transcendentals=0,
                                      bytes_accessed=bytes_accessed),
    )(x, w1k, b1p, wfk, bfp)

    # Tiny final reduction over per-tile minima (num_tiles values).
    return jnp.min(partial_mins)


def make_property_weights(n_classes: int, true_class_index: int) -> np.ndarray:
    """Rows: e_true - e_i for every i != true_class_index; shape (n_classes-1, n_classes)."""
    cases = []
    for i in range(n_classes):
        if i == true_class_index:
            continue
        case = [0.0] * n_classes
        case[true_class_index] = 1.0
        case[i] = -1.0
        cases.append(case)
    return np.asarray(cases, dtype=np.float32)


if __name__ == "__main__":
    # Small shapes consistent with the forward pass (flattened input MLP).
    B, F, H, C = 2, 64, 32, 10
    true_class_index = 3

    key = jax.random.PRNGKey(0)
    kx, k1, kb1, k2, kb2, kx2 = jax.random.split(key, 6)

    x = jax.random.normal(kx, (B, F), dtype=jnp.float32)

    # Deterministic synthetic base-network parameters (stored as (in, out)).
    w1 = jax.random.normal(k1, (F, H), dtype=jnp.float32) * 0.1
    b1 = jax.random.normal(kb1, (1, H), dtype=jnp.float32) * 0.1
    w2 = jax.random.normal(k2, (H, C), dtype=jnp.float32) * 0.1
    b2 = jax.random.normal(kb2, (1, C), dtype=jnp.float32) * 0.1

    # Property layer weights (bias-free Linear with `cases` matrix); kernel wants (C, C-1).
    cases = make_property_weights(C, true_class_index)      # (C-1, C)
    wp = jnp.asarray(cases.T)                                # (C, C-1)

    def reference(xv):
        logits = jnp.maximum(xv @ w1 + b1, 0.0) @ w2 + b2
        return jnp.min(logits @ wp)

    # 1) Exact f32 path, tiny batch (single grid step, block == full array).
    ref = reference(x)
    res_f32 = verification_network_forward(x, w1, b1, w2, b2, wp, use_bf16=False)
    jax.block_until_ready(res_f32)
    assert jnp.allclose(res_f32, ref, rtol=1e-5, atol=1e-5), (res_f32, ref)

    # 2) bf16 screening path, tiny batch (looser tolerance: bf16 MXU operands).
    res_bf16 = verification_network_forward(x, w1, b1, w2, b2, wp, use_bf16=True)
    jax.block_until_ready(res_bf16)
    assert jnp.allclose(res_bf16, ref, rtol=5e-2, atol=5e-2), (res_bf16, ref)

    # 3) Larger batch, default tiling: two tiles (v7x megacore split) + in-kernel
    #    +inf row masking (300 rows covered by 2 x 152-row tiles, no x copy).
    xb = jax.random.normal(kx2, (300, F), dtype=jnp.float32)
    ref_b = reference(xb)
    res_b = verification_network_forward(xb, w1, b1, w2, b2, wp)
    jax.block_until_ready(res_b)
    assert jnp.allclose(res_b, ref_b, rtol=5e-2, atol=5e-2), (res_b, ref_b)

    # 4) B > batch_tile: streamed tiles with a ragged (masked) last tile, exact f32.
    res_b32 = verification_network_forward(xb, w1, b1, w2, b2, wp,
                                           batch_tile=128, use_bf16=False)
    jax.block_until_ready(res_b32)
    assert jnp.allclose(res_b32, ref_b, rtol=1e-5, atol=1e-5), (res_b32, ref_b)

    print("KERNEL_OK")
</pallas_src>

<mosaic_0001>
module attributes {stable_mosaic.version = 11 : i64} {
  func.func @_verification_kernel(%arg0: i32, %arg1: memref<2x64xf32, #tpu.memory_space<vmem>>, %arg2: memref<64x128xf32, #tpu.memory_space<vmem>>, %arg3: memref<1x128xf32, #tpu.memory_space<vmem>>, %arg4: memref<128x128xf32, #tpu.memory_space<vmem>>, %arg5: memref<1x128xf32, #tpu.memory_space<vmem>>, %arg6: memref<1x1xf32, #tpu.memory_space<smem>>) attributes {dimension_semantics = [#tpu.dimension_semantics<parallel>], iteration_bounds = array<i64: 1>, scalar_prefetch = 0 : i64, scratch_operands = 0 : i64, tpu.core_type = #tpu.core_type<tc>, window_params = [{transform_indices = @transform_0, window_bounds = array<i64: 2, 64>}, {pipeline_mode = #tpu.pipeline_mode<synchronous>, transform_indices = @transform_1, window_bounds = array<i64: 64, 128>}, {pipeline_mode = #tpu.pipeline_mode<synchronous>, transform_indices = @transform_2, window_bounds = array<i64: 1, 128>}, {pipeline_mode = #tpu.pipeline_mode<synchronous>, transform_indices = @transform_3, window_bounds = array<i64: 128, 128>}, {pipeline_mode = #tpu.pipeline_mode<synchronous>, transform_indices = @transform_4, window_bounds = array<i64: 1, 128>}, {transform_indices = @transform_5, window_bounds = array<i64: 1, 1>}]} {
    %c0 = arith.constant 0 : index
    %c0_0 = arith.constant 0 : index
    %0 = vector.load %arg1[%c0, %c0_0] : memref<2x64xf32, #tpu.memory_space<vmem>>, vector<2x64xf32>
    %c0_1 = arith.constant 0 : index
    %c0_2 = arith.constant 0 : index
    %1 = vector.load %arg2[%c0_1, %c0_2] : memref<64x128xf32, #tpu.memory_space<vmem>>, vector<64x128xf32>
    %cst = arith.constant dense<0.000000e+00> : vector<2x128xf32>
    %2 = tpu.matmul %0, %1, %cst {dimension_numbers = #tpu.dot_dimension_numbers<[1], [0], [0], [1], [0, 0, 1, 1], [], []>} : vector<2x64xf32>, vector<64x128xf32>, vector<2x128xf32> -> vector<2x128xf32>
    %c0_3 = arith.constant 0 : index
    %c0_4 = arith.constant 0 : index
    %3 = vector.load %arg3[%c0_3, %c0_4] : memref<1x128xf32, #tpu.memory_space<vmem>>, vector<1x128xf32>
    %4 = vector.broadcast %3 : vector<1x128xf32> to vector<2x128xf32>
    %5 = arith.addf %2, %4 : vector<2x128xf32>
    %cst_5 = arith.constant 0.000000e+00 : f32
    %6 = vector.broadcast %cst_5 : f32 to vector<2x128xf32>
    %7 = arith.maximumf %5, %6 : vector<2x128xf32>
    %c0_6 = arith.constant 0 : index
    %c0_7 = arith.constant 0 : index
    %8 = vector.load %arg4[%c0_6, %c0_7] : memref<128x128xf32, #tpu.memory_space<vmem>>, vector<128x128xf32>
    %cst_8 = arith.constant dense<0.000000e+00> : vector<2x128xf32>
    %9 = tpu.matmul %7, %8, %cst_8 {dimension_numbers = #tpu.dot_dimension_numbers<[1], [0], [0], [1], [0, 0, 1, 1], [], []>} : vector<2x128xf32>, vector<128x128xf32>, vector<2x128xf32> -> vector<2x128xf32>
    %c0_9 = arith.constant 0 : index
    %c0_10 = arith.constant 0 : index
    %10 = vector.load %arg5[%c0_9, %c0_10] : memref<1x128xf32, #tpu.memory_space<vmem>>, vector<1x128xf32>
    %11 = vector.broadcast %10 : vector<1x128xf32> to vector<2x128xf32>
    %12 = arith.addf %9, %11 : vector<2x128xf32>
    %13 = vector.shape_cast %12 : vector<2x128xf32> to vector<1x2x128xf32>
    %cst_11 = arith.constant dense<0x7F800000> : vector<1xf32>
    %14 = vector.multi_reduction <minimumf>, %13, %cst_11 [1, 2] : vector<1x2x128xf32> to vector<1xf32>
    %15 = vector.shape_cast %14 : vector<1xf32> to vector<1x1x1xf32>
    %16 = vector.extract %15[0, 0, 0] : f32 from vector<1x1x1xf32>
    %c0_12 = arith.constant 0 : index
    %c0_13 = arith.constant 0 : index
    %17 = memref.load %arg6[%c0_12, %c0_13] : memref<1x1xf32, #tpu.memory_space<smem>>
    memref.store %16, %arg6[%c0_12, %c0_13] : memref<1x1xf32, #tpu.memory_space<smem>>
    return
  }
  func.func @transform_0(%arg0: i32) -> (i32, i32) {
    %c0_i32 = arith.constant 0 : i32
    %c0_i32_0 = arith.constant 0 : i32
    return %arg0, %c0_i32 : i32, i32
  }
  func.func @transform_1(%arg0: i32) -> (i32, i32) {
    %c0_i32 = arith.constant 0 : i32
    %c0_i32_0 = arith.constant 0 : i32
    %c0_i32_1 = arith.constant 0 : i32
    return %c0_i32, %c0_i32_0 : i32, i32
  }
  func.func @transform_2(%arg0: i32) -> (i32, i32) {
    %c0_i32 = arith.constant 0 : i32
    %c0_i32_0 = arith.constant 0 : i32
    %c0_i32_1 = arith.constant 0 : i32
    return %c0_i32, %c0_i32_0 : i32, i32
  }
  func.func @transform_3(%arg0: i32) -> (i32, i32) {
    %c0_i32 = arith.constant 0 : i32
    %c0_i32_0 = arith.constant 0 : i32
    %c0_i32_1 = arith.constant 0 : i32
    return %c0_i32, %c0_i32_0 : i32, i32
  }
  func.func @transform_4(%arg0: i32) -> (i32, i32) {
    %c0_i32 = arith.constant 0 : i32
    %c0_i32_0 = arith.constant 0 : i32
    %c0_i32_1 = arith.constant 0 : i32
    return %c0_i32, %c0_i32_0 : i32, i32
  }
  func.func @transform_5(%arg0: i32) -> (i32, i32) {
    %c0_i32 = arith.constant 0 : i32
    %c0_i32_0 = arith.constant 0 : i32
    return %arg0, %c0_i32 : i32, i32
  }
}

</mosaic_0001>

<bundles_post_ra>
// kernel: tpu_custom_call.1
= control target key start
LH: loop header
LB: loop body
LE: loop exit
PB: predicated region body
PF: predicated region fallthrough
CT: control target
= control target key end

     0   :  { %10 = vsyncpa [#allocation3], 0  ;;  %s583_s0 = inlined_call_operand.hbm [shape: f32[2,64], index: 0, kind: input, shape index: {}]   ;;  %s584_s1 = inlined_call_operand.hbm [shape: f32[64,128], index: 1, kind: input, shape index: {}]   ;;  %s585_s2 = inlined_call_operand.vmem [shape: f32[1,128], index: 2, kind: input, shape index: {}]   ;;  %s586_s3 = inlined_call_operand.hbm [shape: f32[128,128], index: 3, kind: input, shape index: {}]   ;;  %s587_s4 = inlined_call_operand.vmem [shape: f32[1,128], index: 4, kind: input, shape index: {}]   ;;  %s588_s5 = inlined_call_operand.hbm [shape: f32[1,1], index: 5, kind: output, shape index: {}]  }
   0x1   :  { %11 = vsyncpa [#allocation6], 0 }
   0x2   :  { %12 = vsyncpa [#allocation4], 0  ;;  %s484_s18 = smov [#allocation5]   ;;  %s402_s22 = scalar_lea.hbm %s584_s1, 1024 }
   0x3   :  { %s28_s19 = sshll.u32 %s484_s18, 4  ;;  %p403_p0 = scmp.ne.s32.totalorder %s584_s1, %s402_s22  ;;  %s29_s19 = int_to_ptr.vmem [resolvable:$true] %s28_s19 }
   0x4   :  { %p406_p1 = scmp.lt.u32.totalorder %s402_s22, %s584_s1 }
   0x6   :  { %p408_p2 = pnand %p406_p1, %p403_p0 }
   0x8   :  { %411 = shalt.err (!%p408_p2)
}
   0x9   :  { %s412_s27 = scalar_lea.vmem %s29_s19, 1024  ;;  %p417_p4 = scmp.lt.s32.totalorder %s29_s19, %s29_s19 }
   0xa   :  { %p413_p3 = scmp.ne.s32.totalorder %s29_s19, %s412_s27  ;;  %p418_p5 = scmp.lt.s32.totalorder %s412_s27, %s412_s27 }
   0xc   :  { %p419_p6 = por %p418_p5, %p417_p4 }
   0xe   :  { %p420_p7 = pnand %p419_p6, %p413_p3 }
  0x10   :  { %423 = shalt.err (!%p420_p7)
}
  0x11   :  { %s485_s28 = smov 128   ;;  %s486_s29 = smov 8  }
  0x12   :  { %34 = dma.hbm_to_vmem [thread:$0]  %s584_s1, 1024, %s29_s19, [#allocation6], %s485_s28, %s485_s28, %s486_s29  }
  0x13   :  { %s487_s7 = smov [#allocation2]   ;;  %s488_s9 = smov [#allocation7]  }
  0x14   :  { %s19_s8 = sshll.u32 %s487_s7, 4  ;;  %s42_s10 = sshll.u32 %s488_s9, 4  ;;  %s20_s8 = int_to_ptr.vmem [resolvable:$true] %s19_s8  ;;  %s43_s10 = int_to_ptr.vmem [resolvable:$true] %s42_s10 }
  0x15   :  { %s424_s13 = scalar_lea.hbm %s583_s0, 32 }
  0x16   :  { %p425_p8 = scmp.ne.s32.totalorder %s583_s0, %s424_s13  ;;  %p428_p9 = scmp.lt.u32.totalorder %s424_s13, %s583_s0 }
  0x18   :  { %p430_p10 = pnand %p428_p9, %p425_p8 }
  0x1a   :  { %433 = shalt.err (!%p430_p10)
}
  0x1b   :  { %s434_s1 = scalar_lea.vmem %s20_s8, 32  ;;  %p439_p12 = scmp.lt.s32.totalorder %s20_s8, %s20_s8 }
  0x1c   :  { %p435_p11 = scmp.ne.s32.totalorder %s20_s8, %s434_s1  ;;  %p440_p13 = scmp.lt.s32.totalorder %s434_s1, %s434_s1 }
  0x1e   :  { %p441_p0 = por %p440_p13, %p439_p12 }
  0x20   :  { %p442_p1 = pnand %p441_p0, %p435_p11 }
  0x22   :  { %445 = shalt.err (!%p442_p1)
}
  0x23   :  { %22 = dma.hbm_to_vmem [thread:$0]  %s583_s0, 32, %s20_s8, [#allocation3]  }
  0x24   :  { %s446_s22 = scalar_lea.hbm %s586_s3, 2048 }
  0x25   :  { %p447_p2 = scmp.ne.s32.totalorder %s586_s3, %s446_s22  ;;  %p450_p3 = scmp.lt.u32.totalorder %s446_s22, %s586_s3 }
  0x27   :  { %p452_p4 = pnand %p450_p3, %p447_p2 }
  0x29   :  { %455 = shalt.err (!%p452_p4)
}
  0x2a   :  { %s456_s27 = scalar_lea.vmem %s43_s10, 2048  ;;  %p461_p6 = scmp.lt.s32.totalorder %s43_s10, %s43_s10 }
  0x2b   :  { %p457_p5 = scmp.ne.s32.totalorder %s43_s10, %s456_s27  ;;  %p462_p7 = scmp.lt.s32.totalorder %s456_s27, %s456_s27 }
  0x2d   :  { %p463_p8 = por %p462_p7, %p461_p6 }
  0x2f   :  { %p464_p9 = pnand %p463_p8, %p457_p5 }
  0x31   :  { %467 = shalt.err (!%p464_p9)
}
  0x32   :  { %48 = dma.hbm_to_vmem [thread:$0]  %s586_s3, 2048, %s43_s10, [#allocation6], %s485_s28, %s485_s28, %s486_s29  }
  0x33   :  { %478 = dma.done.wait [#allocation3], 32  }
  0x34   :  { %479 = vsyncadd [#allocation3], 4294967264 }
  0x35   :  { %480 = dma.done.wait [#allocation6], 3072  }
  0x36   :  { %481 = vsyncadd [#allocation6], 4294964224  ;;  %v489_v0 = vmov 0.0|0.0   ;;  %vm490_vm0 = vmmov 0   ;;  %v491_v1 = vmov 0.0   ;;  %v61_v2 = vld [vmem:[#allocation5] sm:$0xff] }
  0x37   :  { %355 = vmatprep.subr.bf16.mxu0 %v489_v0  ;;  %317 = vmatprep.mubr.msk.f32.mxu0 %vm490_vm0, %v491_v1  ;;  %v62_v3 = vld [vmem:[#allocation5 + $0x8] sm:$0xff]  ;;  %v63_v4 = vld [vmem:[#allocation5 + $0x10] sm:$0xff]  ;;  %v64_v6 = vld [vmem:[#allocation5 + $0x18] sm:$0xff]  ;;  %vm76_vm1 = vcmask 523264   ;;  %vm244_vm2 = vcmask 1041408  }
  0x38   :  { %367 = vmatprep.subr.bf16.mxu1 %v489_v0  ;;  %352 = vmatprep.mubr.msk.f32.mxu1 %vm490_vm0, %v491_v1  ;;  %v356_v5 = vpack.c.bf16 %v62_v3, %v61_v2  ;;  %v359_v7 = vpack.c.bf16 %v64_v6, %v63_v4  ;;  %v151_v8 = vld [vmem:[#allocation7] sm:$0xff]  ;;  %v152_v9 = vld [vmem:[#allocation7 + $0x8] sm:$0xff]  ;;  %v153_v10 = vld [vmem:[#allocation7 + $0x10] sm:$0xff] }
  0x39   :  { %v65_v11 = vld [vmem:[#allocation5 + $0x20] sm:$0xff]  ;;  %v66_v12 = vld [vmem:[#allocation5 + $0x28] sm:$0xff]  ;;  %v368_v13 = vpack.c.bf16 %v152_v9, %v151_v8  ;;  %v154_v14 = vld [vmem:[#allocation7 + $0x18] sm:$0xff] }
  0x3a   :  { %357 = vmatpush3.bf16.msra.mxu0 %v356_v5  ;;  %v371_v15 = vpack.c.bf16 %v154_v14, %v153_v10  ;;  %v362_v16 = vpack.c.bf16 %v66_v12, %v65_v11  ;;  %v155_v17 = vld [vmem:[#allocation7 + $0x20] sm:$0xff]  ;;  %v156_v18 = vld [vmem:[#allocation7 + $0x28] sm:$0xff]  ;;  %v67_v19 = vld [vmem:[#allocation5 + $0x30] sm:$0xff] }
  0x3b   :  { %358 = vmatprep.subr.bf16.mxu0 %v489_v0  ;;  %369 = vmatpush3.bf16.msra.mxu1 %v368_v13  ;;  %v68_v20 = vld [vmem:[#allocation5 + $0x38] sm:$0xff]  ;;  %v374_v21 = vpack.c.bf16 %v156_v18, %v155_v17  ;;  %v157_v23 = vld [vmem:[#allocation7 + $0x30] sm:$0xff]  ;;  %v159_v27 = vld [vmem:[#allocation7 + $0x40] sm:$0xff] }
  0x3c   :  { %370 = vmatprep.subr.bf16.mxu1 %v489_v0  ;;  %v365_v22 = vpack.c.bf16 %v68_v20, %v67_v19  ;;  %v158_v24 = vld [vmem:[#allocation7 + $0x38] sm:$0xff]  ;;  %v160_v28 = vld [vmem:[#allocation7 + $0x48] sm:$0xff]  ;;  %v161_v30 = vld [vmem:[#allocation7 + $0x50] sm:$0xff] }
  0x3d   :  { %v377_v25 = vpack.c.bf16 %v158_v24, %v157_v23  ;;  %v60_v26 = vld [vmem:[#allocation2] sm:$0x3]  ;;  %v380_v29 = vpack.c.bf16 %v160_v28, %v159_v27  ;;  %v163_v33 = vld [vmem:[#allocation7 + $0x60] sm:$0xff]  ;;  %v164_v34 = vld [vmem:[#allocation7 + $0x68] sm:$0xff] }
  0x3e   :  { %360 = vmatpush3.bf16.msra.mxu0 %v359_v7  ;;  %v162_v31 = vld [vmem:[#allocation7 + $0x58] sm:$0xff]  ;;  %v386_v35 = vpack.c.bf16 %v164_v34, %v163_v33  ;;  %v165_v36 = vld [vmem:[#allocation7 + $0x70] sm:$0xff] }
  0x3f   :  { %361 = vmatprep.subr.bf16.mxu0 %v489_v0  ;;  %372 = vmatpush3.bf16.msra.mxu1 %v371_v15  ;;  %v383_v32 = vpack.c.bf16 %v162_v31, %v161_v30  ;;  %v166_v37 = vld [vmem:[#allocation7 + $0x78] sm:$0xff] }
  0x40   :  { %373 = vmatprep.subr.bf16.mxu1 %v489_v0  ;;  %v389_v38 = vpack.c.bf16 %v166_v37, %v165_v36  ;;  %v272_v39 = vld [vmem:[%s585_s2] ss:$0 sm:$0xff] }
  0x41   :  { %v274_v44 = vld [vmem:[%s587_s4] ss:$0 sm:$0xff]  ;;  %s468_s4 = scalar_lea.hbm %s588_s5, 16 }
  0x42   :  { %363 = vmatpush3.bf16.msra.mxu0 %v362_v16  ;;  %p469_p10 = scmp.ne.s32.totalorder %s588_s5, %s468_s4  ;;  %p472_p11 = scmp.lt.u32.totalorder %s468_s4, %s588_s5 }
  0x43   :  { %364 = vmatprep.subr.bf16.mxu0 %v489_v0  ;;  %375 = vmatpush3.bf16.msra.mxu1 %v374_v21 }
  0x44   :  { %376 = vmatprep.subr.bf16.mxu1 %v489_v0  ;;  %p474_p12 = pnand %p472_p11, %p469_p10 }
  0x46   :  { %366 = vmatpush3.bf16.msra.mxu0 %v365_v22 }
  0x47   :  { %378 = vmatpush3.bf16.msra.mxu1 %v377_v25 }
  0x48   :  { %379 = vmatprep.subr.bf16.mxu1 %v489_v0 }
  0x49   :  { %318 = vmatmul.mubr.msk.f32.vlgmr.msra.gmra.mrb[0].mxu0 %vm76_vm1, %v60_v26 }
  0x4b   :  { %381 = vmatpush3.bf16.msra.mxu1 %v380_v29 }
  0x4c   :  { %382 = vmatprep.subr.bf16.mxu1 %v489_v0 }
  0x4f   :  { %384 = vmatpush3.bf16.msra.mxu1 %v383_v32 }
  0x50   :  { %385 = vmatprep.subr.bf16.mxu1 %v489_v0 }
  0x53   :  { %387 = vmatpush3.bf16.msra.mxu1 %v386_v35 }
  0x54   :  { %388 = vmatprep.subr.bf16.mxu1 %v489_v0 }
  0x57   :  { %390 = vmatpush3.bf16.msra.mxu1 %v389_v38 }
 0x11c   :  { %v146_v40 = vpop.f32.mrb[0].mxu0 }
 0x11d   :  { %v147_v41 = vadd.f32 %v272_v39, %v146_v40  ;;  %v319_v42 = vpop.f32.mrb[1].mxu0 }
 0x11f   :  { %v150_v43 = vmax.f32 %v147_v41, 0.0 }
 0x121   :  { %353 = vmatmul.mubr.f32.vlgmr.msra.gmra.mrb[0].mxu1 %v150_v43 }
 0x1f4   :  { %v240_v45 = vpop.f32.mrb[0].mxu1 }
 0x1f5   :  { %v241_v46 = vadd.f32 %v274_v44, %v240_v45  ;;  %v354_v47 = vpop.f32.mrb[1].mxu1 }
 0x1f7   :  { %v245_v48 = vsel %vm244_vm2, %v241_v46, inf }
 0x1f8   :  { %246 = vmin.xlane.f32.xlu0 %v245_v48 }
 0x285   :  { %v247_v49 = vpop.xlane.xlu0 %246 }
 0x286   :  { %v248_v50 = vrot.slane %v247_v49, 4 }
 0x288   :  { %v249_v51 = vmin.f32 %v247_v49, %v248_v50 }
 0x28a   :  { %v250_v52 = vrot.slane %v249_v51, 2 }
 0x28c   :  { %v251_v53 = vmin.f32 %v249_v51, %v250_v52 }
 0x28e   :  { %v252_v54 = vrot.slane %v251_v53, 1 }
 0x290   :  { %v253_v55 = vmin.f32 %v251_v53, %v252_v54 }
 0x292   :  { %391 = vpush %v253_v55 }
 0x2c3   :  { %s392_s2 = spop %391 }
 0x2c4   :  { %256 = sst [smem:[#allocation8]] %s392_s2 }
 0x2c5   :  { %477 = shalt.err (!%p474_p12)
}
 0x2c6   :  { %s492_s13 = smov [#allocation8]  }
 0x2c7   :  { %264 = dma.smem_to_hbm %s492_s13, 16, %s588_s5, [#allocation4]  }
 0x2c8   :  { %482 = dma.done.wait [#allocation4], 16  }
 0x2c9   :  { %483 = vsyncadd [#allocation4], 4294967280 }
 0x2ca   :  { %268 = sfence }
 0x2cb   :  { %269 = vsyncpa [#allocation3], 1 }
 0x2cc   :  { %270 = vsyncpa [#allocation6], 1 }
 0x2cd   :  { %271 = vsyncpa [#allocation4], 1 }

</bundles_post_ra>
